<compile_context>
chip_gen: v7x
topology: tpu7x:2x2x1
jax: 0.10.0
libtpu: 0.0.40
codegen_flags: <defaults>
</compile_context>

<pallas_src>
import jax
import jax.numpy as jnp
from jax.experimental import pallas as pl
from jax.experimental.pallas import tpu as pltpu

# PonderNet hyper-parameters (registered buffers in the PyTorch module).
EPSILON = 0.05      # used only by eps_forward (dynamic=True path)
LAMBDA_P = 0.2      # prior geometric parameter (used by regularisation/loss)
BETA = 0.01         # prior weight (used by loss, not forward)
N_MAX = 8           # maximum unroll length

# Problem sizes for the synthetic ponder module.
BATCH = 2
FEATURES = 16
HIDDEN = 32
OUTPUT = 8

FUSED = 128         # HIDDEN + OUTPUT + 1 = 41, padded to one full 128-lane vreg


def ponder_kernel(x_ref, wxp_ref, wf_ref, bias_ref, ys_ref, probs_ref):
    """Full PonderNet unroll (N_MAX steps) with one fused MXU matmul per step."""
    b = x_ref.shape[0]

    # ---- Loop-invariant loads (hoisted: JAX does not CSE these across the unroll).
    wf = wf_ref[...]                               # [HIDDEN, FUSED]  bf16
    bias = bias_ref[...]                           # [1, FUSED]       f32
    x_b = x_ref[...].astype(jnp.bfloat16)          # [b, FEATURES]    bf16

    # base = [ x@Wx + bh | by | bl | 0...0 ]  -- x projection computed exactly once.
    base = jnp.dot(x_b, wxp_ref[...],
                   preferred_element_type=jnp.float32) + bias     # [b, FUSED] f32

    # h_1 = tanh(x@Wx + bh)  (h_0 = 0, so the Wh term vanishes).
    h = jnp.tanh(base[:, :HIDDEN])                 # [b, HIDDEN] f32

    un_halted = jnp.ones((b, 1), jnp.float32)
    probs = jnp.zeros((b, N_MAX), jnp.float32)
    lane = jax.lax.broadcasted_iota(jnp.int32, (b, N_MAX), 1)

    # Static unroll: N_MAX is small and known at trace time.
    for n in range(N_MAX):
        # One fused matmul per step: h_n @ [Wh | Wy | wl]  (+ base adds bh/by/bl).
        fused = base + jnp.dot(h.astype(jnp.bfloat16), wf,
                               preferred_element_type=jnp.float32)   # [b, FUSED]

        y = fused[:, HIDDEN:HIDDEN + OUTPUT]       # y_n = h_n @ Wy + by
        ys_ref[n] = y.astype(ys_ref.dtype)         # per-step store (idle vst slot)

        if n == N_MAX - 1:
            # Remainder of the probability mass goes to the last step so the
            # halting distribution sums to 1 (standard PonderNet forward).
            p = un_halted
        else:
            lam = jax.nn.sigmoid(
                fused[:, HIDDEN + OUTPUT:HIDDEN + OUTPUT + 1])       # [b, 1] f32
            p = un_halted * lam
            un_halted = un_halted * (1.0 - lam)
            # Next hidden: h_{n+1} = tanh(x@Wx + h_n@Wh + bh).
            h = jnp.tanh(fused[:, :HIDDEN])

        # Accumulate halting probs in a register (no concatenate / XLU epilogue).
        probs = jnp.where(lane == n, p, probs)

    probs_ref[...] = probs                         # single lane-dense-ish store


def _fuse_params(params):
    """Build padded/fused weight slabs in the wrapper (not inside the kernel)."""
    h, o = HIDDEN, OUTPUT
    # [Wh | Wy | wl | 0] -> [HIDDEN, FUSED], bf16 for single-pass MXU.
    w_fused = jnp.zeros((h, FUSED), jnp.float32)
    w_fused = w_fused.at[:, :h].set(params["wh"])
    w_fused = w_fused.at[:, h:h + o].set(params["wy"])
    w_fused = w_fused.at[:, h + o:h + o + 1].set(params["wl"])
    w_fused = w_fused.astype(jnp.bfloat16)
    # [Wx | 0] -> [FEATURES, FUSED], bf16.
    wx_pad = jnp.zeros((FEATURES, FUSED), jnp.float32)
    wx_pad = wx_pad.at[:, :h].set(params["wx"]).astype(jnp.bfloat16)
    # [bh | by | bl | 0] -> [1, FUSED], f32 (biases stay full precision).
    bias = jnp.zeros((1, FUSED), jnp.float32)
    bias = bias.at[:, :h].set(params["bh"])
    bias = bias.at[:, h:h + o].set(params["by"])
    bias = bias.at[:, h + o:h + o + 1].set(params["bl"])
    return wx_pad, w_fused, bias


def ponder_forward(x, params):
    """PonderNet forward pass (dynamic=False). Returns (ys, halt_probs)."""
    b, f = x.shape
    wx_pad, w_fused, bias = _fuse_params(params)

    # Tile the batch over a parallel grid axis (sharded across TCs on v7x).
    block_b = b
    for cand in (512, 256, 128):
        if b % cand == 0:
            block_b = cand
            break
    grid = (b // block_b,)

    in_specs = [
        pl.BlockSpec((block_b, f), lambda i: (i, 0)),
        pl.BlockSpec((f, FUSED), lambda i: (0, 0)),        # weights resident in VMEM
        pl.BlockSpec((HIDDEN, FUSED), lambda i: (0, 0)),
        pl.BlockSpec((1, FUSED), lambda i: (0, 0)),
    ]
    out_specs = [
        pl.BlockSpec((N_MAX, block_b, OUTPUT), lambda i: (0, i, 0)),
        pl.BlockSpec((block_b, N_MAX), lambda i: (i, 0)),
    ]

    ys, probs = pl.pallas_call(
        ponder_kernel,
        grid=grid,
        in_specs=in_specs,
        out_specs=out_specs,
        out_shape=(jax.ShapeDtypeStruct((N_MAX, b, OUTPUT), jnp.float32),
                   jax.ShapeDtypeStruct((b, N_MAX), jnp.float32)),
        compiler_params=pltpu.CompilerParams(
            dimension_semantics=("parallel",)),
    )(x, wx_pad, w_fused, bias)
    return ys, probs


def ponder_reference(x, params):
    """Pure-JAX reference with matching bf16 matmul casts (for validation)."""
    wx_pad, w_fused, bias = _fuse_params(params)
    base = jnp.dot(x.astype(jnp.bfloat16), wx_pad,
                   preferred_element_type=jnp.float32) + bias
    h = jnp.tanh(base[:, :HIDDEN])
    un_halted = jnp.ones((x.shape[0], 1), jnp.float32)
    ys, ps = [], []
    for n in range(N_MAX):
        fused = base + jnp.dot(h.astype(jnp.bfloat16), w_fused,
                               preferred_element_type=jnp.float32)
        ys.append(fused[:, HIDDEN:HIDDEN + OUTPUT])
        if n == N_MAX - 1:
            ps.append(un_halted)
        else:
            lam = jax.nn.sigmoid(fused[:, HIDDEN + OUTPUT:HIDDEN + OUTPUT + 1])
            ps.append(un_halted * lam)
            un_halted = un_halted * (1.0 - lam)
            h = jnp.tanh(fused[:, :HIDDEN])
    return jnp.stack(ys, axis=0), jnp.concatenate(ps, axis=1)


def init_params(key):
    ks = jax.random.split(key, 6)
    scale = 0.1
    return {
        "wx": scale * jax.random.normal(ks[0], (FEATURES, HIDDEN), jnp.float32),
        "wh": scale * jax.random.normal(ks[1], (HIDDEN, HIDDEN), jnp.float32),
        "bh": jnp.zeros((1, HIDDEN), jnp.float32),
        "wy": scale * jax.random.normal(ks[2], (HIDDEN, OUTPUT), jnp.float32),
        "by": jnp.zeros((1, OUTPUT), jnp.float32),
        "wl": scale * jax.random.normal(ks[3], (HIDDEN, 1), jnp.float32),
        "bl": jnp.zeros((1, 1), jnp.float32),
    }


if __name__ == "__main__":
    key = jax.random.PRNGKey(0)
    k_x, k_p = jax.random.split(key)
    x = jax.random.normal(k_x, (BATCH, FEATURES), jnp.float32)
    params = init_params(k_p)

    ys, halt_probs = ponder_forward(x, params)
    ys, halt_probs = jax.block_until_ready((ys, halt_probs))

    # Metrics the PyTorch forward logs (halt_dist.mean + 1, n_steps) — computed
    # in plain JAX from the kernel outputs, not inside the kernel.
    halt_mean = jnp.sum(halt_probs * jnp.arange(N_MAX, dtype=jnp.float32), axis=-1)
    _ = float(jnp.mean(halt_mean) + 1.0)
    _ = N_MAX
    # TODO(synk): regularisation()/loss() (KL vs truncated geometric prior) and
    # eps_forward (dynamic=True early-exit) are training/host-side utilities
    # outside forward(); not implemented as kernels.

    # Structural checks.
    assert ys.shape == (N_MAX, BATCH, OUTPUT)
    assert halt_probs.shape == (BATCH, N_MAX)
    # Halting distribution sums to 1 (recursion kept strictly in f32).
    assert bool(jnp.all(jnp.abs(jnp.sum(halt_probs, axis=-1) - 1.0) < 1e-5))

    # Numerical check against a pure-JAX reference with the same bf16 casts.
    ys_ref, probs_ref = ponder_reference(x, params)
    assert bool(jnp.all(jnp.abs(ys - ys_ref) < 2e-2))
    assert bool(jnp.all(jnp.abs(halt_probs - probs_ref) < 2e-2))

    print("KERNEL_OK")
</pallas_src>

<mosaic_0001>
module attributes {stable_mosaic.version = 11 : i64} {
  func.func @ponder_kernel(%arg0: i32, %arg1: memref<2x16xf32, #tpu.memory_space<vmem>>, %arg2: memref<16x128xbf16, #tpu.memory_space<vmem>>, %arg3: memref<32x128xbf16, #tpu.memory_space<vmem>>, %arg4: memref<1x128xf32, #tpu.memory_space<vmem>>, %arg5: memref<8x2x8xf32, #tpu.memory_space<vmem>>, %arg6: memref<2x8xf32, #tpu.memory_space<vmem>>) attributes {dimension_semantics = [#tpu.dimension_semantics<parallel>], iteration_bounds = array<i64: 1>, scalar_prefetch = 0 : i64, scratch_operands = 0 : i64, tpu.core_type = #tpu.core_type<tc>, window_params = [{transform_indices = @transform_0, window_bounds = array<i64: 2, 16>}, {pipeline_mode = #tpu.pipeline_mode<synchronous>, transform_indices = @transform_1, window_bounds = array<i64: 16, 128>}, {pipeline_mode = #tpu.pipeline_mode<synchronous>, transform_indices = @transform_2, window_bounds = array<i64: 32, 128>}, {pipeline_mode = #tpu.pipeline_mode<synchronous>, transform_indices = @transform_3, window_bounds = array<i64: 1, 128>}, {transform_indices = @transform_4, window_bounds = array<i64: 8, 2, 8>}, {transform_indices = @transform_5, window_bounds = array<i64: 2, 8>}]} {
    %c0 = arith.constant 0 : index
    %c0_0 = arith.constant 0 : index
    %0 = vector.load %arg3[%c0, %c0_0] : memref<32x128xbf16, #tpu.memory_space<vmem>>, vector<32x128xbf16>
    %c0_1 = arith.constant 0 : index
    %c0_2 = arith.constant 0 : index
    %1 = vector.load %arg4[%c0_1, %c0_2] : memref<1x128xf32, #tpu.memory_space<vmem>>, vector<1x128xf32>
    %c0_3 = arith.constant 0 : index
    %c0_4 = arith.constant 0 : index
    %2 = vector.load %arg1[%c0_3, %c0_4] : memref<2x16xf32, #tpu.memory_space<vmem>>, vector<2x16xf32>
    %3 = arith.truncf %2 : vector<2x16xf32> to vector<2x16xbf16>
    %c0_5 = arith.constant 0 : index
    %c0_6 = arith.constant 0 : index
    %4 = vector.load %arg2[%c0_5, %c0_6] : memref<16x128xbf16, #tpu.memory_space<vmem>>, vector<16x128xbf16>
    %cst = arith.constant dense<0.000000e+00> : vector<2x128xf32>
    %5 = tpu.matmul %3, %4, %cst {dimension_numbers = #tpu.dot_dimension_numbers<[1], [0], [0], [1], [0, 0, 1, 1], [], []>} : vector<2x16xbf16>, vector<16x128xbf16>, vector<2x128xf32> -> vector<2x128xf32>
    %6 = vector.broadcast %1 : vector<1x128xf32> to vector<2x128xf32>
    %7 = arith.addf %5, %6 : vector<2x128xf32>
    %8 = vector.extract_strided_slice %7 {offsets = [0, 0], sizes = [2, 32], strides = [1, 1]} : vector<2x128xf32> to vector<2x32xf32>
    %9 = math.tanh %8 : vector<2x32xf32>
    %cst_7 = arith.constant 1.000000e+00 : f32
    %10 = vector.broadcast %cst_7 : f32 to vector<2x1xf32>
    %cst_8 = arith.constant 0.000000e+00 : f32
    %11 = vector.broadcast %cst_8 : f32 to vector<2x8xf32>
    %12 = tpu.iota {dimensions = array<i32: 1>} : vector<2x8xi32>
    %13 = arith.truncf %9 : vector<2x32xf32> to vector<2x32xbf16>
    %cst_9 = arith.constant dense<0.000000e+00> : vector<2x128xf32>
    %14 = tpu.matmul %13, %0, %cst_9 {dimension_numbers = #tpu.dot_dimension_numbers<[1], [0], [0], [1], [0, 0, 1, 1], [], []>} : vector<2x32xbf16>, vector<32x128xbf16>, vector<2x128xf32> -> vector<2x128xf32>
    %15 = arith.addf %7, %14 : vector<2x128xf32>
    %16 = vector.extract_strided_slice %15 {offsets = [0, 32], sizes = [2, 8], strides = [1, 1]} : vector<2x128xf32> to vector<2x8xf32>
    %c0_10 = arith.constant 0 : index
    %c0_11 = arith.constant 0 : index
    %c0_12 = arith.constant 0 : index
    %17 = vector.load %arg5[%c0_10, %c0_11, %c0_12] : memref<8x2x8xf32, #tpu.memory_space<vmem>>, vector<1x2x8xf32>
    %18 = vector.shape_cast %17 : vector<1x2x8xf32> to vector<2x8xf32>
    %19 = vector.shape_cast %16 : vector<2x8xf32> to vector<1x2x8xf32>
    tpu.vector_store %arg5[%c0_10, %c0_11, %c0_12], %19 {strides = array<i32>} : memref<8x2x8xf32, #tpu.memory_space<vmem>>, vector<1x2x8xf32>,
    %20 = vector.extract_strided_slice %15 {offsets = [0, 40], sizes = [2, 1], strides = [1, 1]} : vector<2x128xf32> to vector<2x1xf32>
    %21 = arith.negf %20 : vector<2x1xf32>
    %22 = math.exp %21 : vector<2x1xf32>
    %cst_13 = arith.constant 1.000000e+00 : f32
    %23 = vector.broadcast %cst_13 : f32 to vector<2x1xf32>
    %24 = arith.addf %23, %22 : vector<2x1xf32>
    %25 = arith.divf %23, %24 : vector<2x1xf32>
    %26 = arith.mulf %10, %25 : vector<2x1xf32>
    %cst_14 = arith.constant 1.000000e+00 : f32
    %27 = vector.broadcast %cst_14 : f32 to vector<2x1xf32>
    %28 = arith.subf %27, %25 : vector<2x1xf32>
    %29 = arith.mulf %10, %28 : vector<2x1xf32>
    %30 = vector.extract_strided_slice %15 {offsets = [0, 0], sizes = [2, 32], strides = [1, 1]} : vector<2x128xf32> to vector<2x32xf32>
    %31 = math.tanh %30 : vector<2x32xf32>
    %c0_i32 = arith.constant 0 : i32
    %32 = vector.broadcast %c0_i32 : i32 to vector<2x8xi32>
    %33 = arith.cmpi eq, %12, %32 : vector<2x8xi32>
    %34 = vector.shape_cast %26 : vector<2x1xf32> to vector<2x1xf32>
    %35 = vector.broadcast %34 : vector<2x1xf32> to vector<2x8xf32>
    %36 = arith.select %33, %35, %11 : vector<2x8xi1>, vector<2x8xf32>
    %37 = arith.truncf %31 : vector<2x32xf32> to vector<2x32xbf16>
    %cst_15 = arith.constant dense<0.000000e+00> : vector<2x128xf32>
    %38 = tpu.matmul %37, %0, %cst_15 {dimension_numbers = #tpu.dot_dimension_numbers<[1], [0], [0], [1], [0, 0, 1, 1], [], []>} : vector<2x32xbf16>, vector<32x128xbf16>, vector<2x128xf32> -> vector<2x128xf32>
    %39 = arith.addf %7, %38 : vector<2x128xf32>
    %40 = vector.extract_strided_slice %39 {offsets = [0, 32], sizes = [2, 8], strides = [1, 1]} : vector<2x128xf32> to vector<2x8xf32>
    %c1 = arith.constant 1 : index
    %c0_16 = arith.constant 0 : index
    %c0_17 = arith.constant 0 : index
    %41 = vector.load %arg5[%c1, %c0_16, %c0_17] : memref<8x2x8xf32, #tpu.memory_space<vmem>>, vector<1x2x8xf32>
    %42 = vector.shape_cast %41 : vector<1x2x8xf32> to vector<2x8xf32>
    %43 = vector.shape_cast %40 : vector<2x8xf32> to vector<1x2x8xf32>
    tpu.vector_store %arg5[%c1, %c0_16, %c0_17], %43 {strides = array<i32>} : memref<8x2x8xf32, #tpu.memory_space<vmem>>, vector<1x2x8xf32>,
    %44 = vector.extract_strided_slice %39 {offsets = [0, 40], sizes = [2, 1], strides = [1, 1]} : vector<2x128xf32> to vector<2x1xf32>
    %45 = arith.negf %44 : vector<2x1xf32>
    %46 = math.exp %45 : vector<2x1xf32>
    %cst_18 = arith.constant 1.000000e+00 : f32
    %47 = vector.broadcast %cst_18 : f32 to vector<2x1xf32>
    %48 = arith.addf %47, %46 : vector<2x1xf32>
    %49 = arith.divf %47, %48 : vector<2x1xf32>
    %50 = arith.mulf %29, %49 : vector<2x1xf32>
    %cst_19 = arith.constant 1.000000e+00 : f32
    %51 = vector.broadcast %cst_19 : f32 to vector<2x1xf32>
    %52 = arith.subf %51, %49 : vector<2x1xf32>
    %53 = arith.mulf %29, %52 : vector<2x1xf32>
    %54 = vector.extract_strided_slice %39 {offsets = [0, 0], sizes = [2, 32], strides = [1, 1]} : vector<2x128xf32> to vector<2x32xf32>
    %55 = math.tanh %54 : vector<2x32xf32>
    %c1_i32 = arith.constant 1 : i32
    %56 = vector.broadcast %c1_i32 : i32 to vector<2x8xi32>
    %57 = arith.cmpi eq, %12, %56 : vector<2x8xi32>
    %58 = vector.shape_cast %50 : vector<2x1xf32> to vector<2x1xf32>
    %59 = vector.broadcast %58 : vector<2x1xf32> to vector<2x8xf32>
    %60 = arith.select %57, %59, %36 : vector<2x8xi1>, vector<2x8xf32>
    %61 = arith.truncf %55 : vector<2x32xf32> to vector<2x32xbf16>
    %cst_20 = arith.constant dense<0.000000e+00> : vector<2x128xf32>
    %62 = tpu.matmul %61, %0, %cst_20 {dimension_numbers = #tpu.dot_dimension_numbers<[1], [0], [0], [1], [0, 0, 1, 1], [], []>} : vector<2x32xbf16>, vector<32x128xbf16>, vector<2x128xf32> -> vector<2x128xf32>
    %63 = arith.addf %7, %62 : vector<2x128xf32>
    %64 = vector.extract_strided_slice %63 {offsets = [0, 32], sizes = [2, 8], strides = [1, 1]} : vector<2x128xf32> to vector<2x8xf32>
    %c2 = arith.constant 2 : index
    %c0_21 = arith.constant 0 : index
    %c0_22 = arith.constant 0 : index
    %65 = vector.load %arg5[%c2, %c0_21, %c0_22] : memref<8x2x8xf32, #tpu.memory_space<vmem>>, vector<1x2x8xf32>
    %66 = vector.shape_cast %65 : vector<1x2x8xf32> to vector<2x8xf32>
    %67 = vector.shape_cast %64 : vector<2x8xf32> to vector<1x2x8xf32>
    tpu.vector_store %arg5[%c2, %c0_21, %c0_22], %67 {strides = array<i32>} : memref<8x2x8xf32, #tpu.memory_space<vmem>>, vector<1x2x8xf32>,
    %68 = vector.extract_strided_slice %63 {offsets = [0, 40], sizes = [2, 1], strides = [1, 1]} : vector<2x128xf32> to vector<2x1xf32>
    %69 = arith.negf %68 : vector<2x1xf32>
    %70 = math.exp %69 : vector<2x1xf32>
    %cst_23 = arith.constant 1.000000e+00 : f32
    %71 = vector.broadcast %cst_23 : f32 to vector<2x1xf32>
    %72 = arith.addf %71, %70 : vector<2x1xf32>
    %73 = arith.divf %71, %72 : vector<2x1xf32>
    %74 = arith.mulf %53, %73 : vector<2x1xf32>
    %cst_24 = arith.constant 1.000000e+00 : f32
    %75 = vector.broadcast %cst_24 : f32 to vector<2x1xf32>
    %76 = arith.subf %75, %73 : vector<2x1xf32>
    %77 = arith.mulf %53, %76 : vector<2x1xf32>
    %78 = vector.extract_strided_slice %63 {offsets = [0, 0], sizes = [2, 32], strides = [1, 1]} : vector<2x128xf32> to vector<2x32xf32>
    %79 = math.tanh %78 : vector<2x32xf32>
    %c2_i32 = arith.constant 2 : i32
    %80 = vector.broadcast %c2_i32 : i32 to vector<2x8xi32>
    %81 = arith.cmpi eq, %12, %80 : vector<2x8xi32>
    %82 = vector.shape_cast %74 : vector<2x1xf32> to vector<2x1xf32>
    %83 = vector.broadcast %82 : vector<2x1xf32> to vector<2x8xf32>
    %84 = arith.select %81, %83, %60 : vector<2x8xi1>, vector<2x8xf32>
    %85 = arith.truncf %79 : vector<2x32xf32> to vector<2x32xbf16>
    %cst_25 = arith.constant dense<0.000000e+00> : vector<2x128xf32>
    %86 = tpu.matmul %85, %0, %cst_25 {dimension_numbers = #tpu.dot_dimension_numbers<[1], [0], [0], [1], [0, 0, 1, 1], [], []>} : vector<2x32xbf16>, vector<32x128xbf16>, vector<2x128xf32> -> vector<2x128xf32>
    %87 = arith.addf %7, %86 : vector<2x128xf32>
    %88 = vector.extract_strided_slice %87 {offsets = [0, 32], sizes = [2, 8], strides = [1, 1]} : vector<2x128xf32> to vector<2x8xf32>
    %c3 = arith.constant 3 : index
    %c0_26 = arith.constant 0 : index
    %c0_27 = arith.constant 0 : index
    %89 = vector.load %arg5[%c3, %c0_26, %c0_27] : memref<8x2x8xf32, #tpu.memory_space<vmem>>, vector<1x2x8xf32>
    %90 = vector.shape_cast %89 : vector<1x2x8xf32> to vector<2x8xf32>
    %91 = vector.shape_cast %88 : vector<2x8xf32> to vector<1x2x8xf32>
    tpu.vector_store %arg5[%c3, %c0_26, %c0_27], %91 {strides = array<i32>} : memref<8x2x8xf32, #tpu.memory_space<vmem>>, vector<1x2x8xf32>,
    %92 = vector.extract_strided_slice %87 {offsets = [0, 40], sizes = [2, 1], strides = [1, 1]} : vector<2x128xf32> to vector<2x1xf32>
    %93 = arith.negf %92 : vector<2x1xf32>
    %94 = math.exp %93 : vector<2x1xf32>
    %cst_28 = arith.constant 1.000000e+00 : f32
    %95 = vector.broadcast %cst_28 : f32 to vector<2x1xf32>
    %96 = arith.addf %95, %94 : vector<2x1xf32>
    %97 = arith.divf %95, %96 : vector<2x1xf32>
    %98 = arith.mulf %77, %97 : vector<2x1xf32>
    %cst_29 = arith.constant 1.000000e+00 : f32
    %99 = vector.broadcast %cst_29 : f32 to vector<2x1xf32>
    %100 = arith.subf %99, %97 : vector<2x1xf32>
    %101 = arith.mulf %77, %100 : vector<2x1xf32>
    %102 = vector.extract_strided_slice %87 {offsets = [0, 0], sizes = [2, 32], strides = [1, 1]} : vector<2x128xf32> to vector<2x32xf32>
    %103 = math.tanh %102 : vector<2x32xf32>
    %c3_i32 = arith.constant 3 : i32
    %104 = vector.broadcast %c3_i32 : i32 to vector<2x8xi32>
    %105 = arith.cmpi eq, %12, %104 : vector<2x8xi32>
    %106 = vector.shape_cast %98 : vector<2x1xf32> to vector<2x1xf32>
    %107 = vector.broadcast %106 : vector<2x1xf32> to vector<2x8xf32>
    %108 = arith.select %105, %107, %84 : vector<2x8xi1>, vector<2x8xf32>
    %109 = arith.truncf %103 : vector<2x32xf32> to vector<2x32xbf16>
    %cst_30 = arith.constant dense<0.000000e+00> : vector<2x128xf32>
    %110 = tpu.matmul %109, %0, %cst_30 {dimension_numbers = #tpu.dot_dimension_numbers<[1], [0], [0], [1], [0, 0, 1, 1], [], []>} : vector<2x32xbf16>, vector<32x128xbf16>, vector<2x128xf32> -> vector<2x128xf32>
    %111 = arith.addf %7, %110 : vector<2x128xf32>
    %112 = vector.extract_strided_slice %111 {offsets = [0, 32], sizes = [2, 8], strides = [1, 1]} : vector<2x128xf32> to vector<2x8xf32>
    %c4 = arith.constant 4 : index
    %c0_31 = arith.constant 0 : index
    %c0_32 = arith.constant 0 : index
    %113 = vector.load %arg5[%c4, %c0_31, %c0_32] : memref<8x2x8xf32, #tpu.memory_space<vmem>>, vector<1x2x8xf32>
    %114 = vector.shape_cast %113 : vector<1x2x8xf32> to vector<2x8xf32>
    %115 = vector.shape_cast %112 : vector<2x8xf32> to vector<1x2x8xf32>
    tpu.vector_store %arg5[%c4, %c0_31, %c0_32], %115 {strides = array<i32>} : memref<8x2x8xf32, #tpu.memory_space<vmem>>, vector<1x2x8xf32>,
    %116 = vector.extract_strided_slice %111 {offsets = [0, 40], sizes = [2, 1], strides = [1, 1]} : vector<2x128xf32> to vector<2x1xf32>
    %117 = arith.negf %116 : vector<2x1xf32>
    %118 = math.exp %117 : vector<2x1xf32>
    %cst_33 = arith.constant 1.000000e+00 : f32
    %119 = vector.broadcast %cst_33 : f32 to vector<2x1xf32>
    %120 = arith.addf %119, %118 : vector<2x1xf32>
    %121 = arith.divf %119, %120 : vector<2x1xf32>
    %122 = arith.mulf %101, %121 : vector<2x1xf32>
    %cst_34 = arith.constant 1.000000e+00 : f32
    %123 = vector.broadcast %cst_34 : f32 to vector<2x1xf32>
    %124 = arith.subf %123, %121 : vector<2x1xf32>
    %125 = arith.mulf %101, %124 : vector<2x1xf32>
    %126 = vector.extract_strided_slice %111 {offsets = [0, 0], sizes = [2, 32], strides = [1, 1]} : vector<2x128xf32> to vector<2x32xf32>
    %127 = math.tanh %126 : vector<2x32xf32>
    %c4_i32 = arith.constant 4 : i32
    %128 = vector.broadcast %c4_i32 : i32 to vector<2x8xi32>
    %129 = arith.cmpi eq, %12, %128 : vector<2x8xi32>
    %130 = vector.shape_cast %122 : vector<2x1xf32> to vector<2x1xf32>
    %131 = vector.broadcast %130 : vector<2x1xf32> to vector<2x8xf32>
    %132 = arith.select %129, %131, %108 : vector<2x8xi1>, vector<2x8xf32>
    %133 = arith.truncf %127 : vector<2x32xf32> to vector<2x32xbf16>
    %cst_35 = arith.constant dense<0.000000e+00> : vector<2x128xf32>
    %134 = tpu.matmul %133, %0, %cst_35 {dimension_numbers = #tpu.dot_dimension_numbers<[1], [0], [0], [1], [0, 0, 1, 1], [], []>} : vector<2x32xbf16>, vector<32x128xbf16>, vector<2x128xf32> -> vector<2x128xf32>
    %135 = arith.addf %7, %134 : vector<2x128xf32>
    %136 = vector.extract_strided_slice %135 {offsets = [0, 32], sizes = [2, 8], strides = [1, 1]} : vector<2x128xf32> to vector<2x8xf32>
    %c5 = arith.constant 5 : index
    %c0_36 = arith.constant 0 : index
    %c0_37 = arith.constant 0 : index
    %137 = vector.load %arg5[%c5, %c0_36, %c0_37] : memref<8x2x8xf32, #tpu.memory_space<vmem>>, vector<1x2x8xf32>
    %138 = vector.shape_cast %137 : vector<1x2x8xf32> to vector<2x8xf32>
    %139 = vector.shape_cast %136 : vector<2x8xf32> to vector<1x2x8xf32>
    tpu.vector_store %arg5[%c5, %c0_36, %c0_37], %139 {strides = array<i32>} : memref<8x2x8xf32, #tpu.memory_space<vmem>>, vector<1x2x8xf32>,
    %140 = vector.extract_strided_slice %135 {offsets = [0, 40], sizes = [2, 1], strides = [1, 1]} : vector<2x128xf32> to vector<2x1xf32>
    %141 = arith.negf %140 : vector<2x1xf32>
    %142 = math.exp %141 : vector<2x1xf32>
    %cst_38 = arith.constant 1.000000e+00 : f32
    %143 = vector.broadcast %cst_38 : f32 to vector<2x1xf32>
    %144 = arith.addf %143, %142 : vector<2x1xf32>
    %145 = arith.divf %143, %144 : vector<2x1xf32>
    %146 = arith.mulf %125, %145 : vector<2x1xf32>
    %cst_39 = arith.constant 1.000000e+00 : f32
    %147 = vector.broadcast %cst_39 : f32 to vector<2x1xf32>
    %148 = arith.subf %147, %145 : vector<2x1xf32>
    %149 = arith.mulf %125, %148 : vector<2x1xf32>
    %150 = vector.extract_strided_slice %135 {offsets = [0, 0], sizes = [2, 32], strides = [1, 1]} : vector<2x128xf32> to vector<2x32xf32>
    %151 = math.tanh %150 : vector<2x32xf32>
    %c5_i32 = arith.constant 5 : i32
    %152 = vector.broadcast %c5_i32 : i32 to vector<2x8xi32>
    %153 = arith.cmpi eq, %12, %152 : vector<2x8xi32>
    %154 = vector.shape_cast %146 : vector<2x1xf32> to vector<2x1xf32>
    %155 = vector.broadcast %154 : vector<2x1xf32> to vector<2x8xf32>
    %156 = arith.select %153, %155, %132 : vector<2x8xi1>, vector<2x8xf32>
    %157 = arith.truncf %151 : vector<2x32xf32> to vector<2x32xbf16>
    %cst_40 = arith.constant dense<0.000000e+00> : vector<2x128xf32>
    %158 = tpu.matmul %157, %0, %cst_40 {dimension_numbers = #tpu.dot_dimension_numbers<[1], [0], [0], [1], [0, 0, 1, 1], [], []>} : vector<2x32xbf16>, vector<32x128xbf16>, vector<2x128xf32> -> vector<2x128xf32>
    %159 = arith.addf %7, %158 : vector<2x128xf32>
    %160 = vector.extract_strided_slice %159 {offsets = [0, 32], sizes = [2, 8], strides = [1, 1]} : vector<2x128xf32> to vector<2x8xf32>
    %c6 = arith.constant 6 : index
    %c0_41 = arith.constant 0 : index
    %c0_42 = arith.constant 0 : index
    %161 = vector.load %arg5[%c6, %c0_41, %c0_42] : memref<8x2x8xf32, #tpu.memory_space<vmem>>, vector<1x2x8xf32>
    %162 = vector.shape_cast %161 : vector<1x2x8xf32> to vector<2x8xf32>
    %163 = vector.shape_cast %160 : vector<2x8xf32> to vector<1x2x8xf32>
    tpu.vector_store %arg5[%c6, %c0_41, %c0_42], %163 {strides = array<i32>} : memref<8x2x8xf32, #tpu.memory_space<vmem>>, vector<1x2x8xf32>,
    %164 = vector.extract_strided_slice %159 {offsets = [0, 40], sizes = [2, 1], strides = [1, 1]} : vector<2x128xf32> to vector<2x1xf32>
    %165 = arith.negf %164 : vector<2x1xf32>
    %166 = math.exp %165 : vector<2x1xf32>
    %cst_43 = arith.constant 1.000000e+00 : f32
    %167 = vector.broadcast %cst_43 : f32 to vector<2x1xf32>
    %168 = arith.addf %167, %166 : vector<2x1xf32>
    %169 = arith.divf %167, %168 : vector<2x1xf32>
    %170 = arith.mulf %149, %169 : vector<2x1xf32>
    %cst_44 = arith.constant 1.000000e+00 : f32
    %171 = vector.broadcast %cst_44 : f32 to vector<2x1xf32>
    %172 = arith.subf %171, %169 : vector<2x1xf32>
    %173 = arith.mulf %149, %172 : vector<2x1xf32>
    %174 = vector.extract_strided_slice %159 {offsets = [0, 0], sizes = [2, 32], strides = [1, 1]} : vector<2x128xf32> to vector<2x32xf32>
    %175 = math.tanh %174 : vector<2x32xf32>
    %c6_i32 = arith.constant 6 : i32
    %176 = vector.broadcast %c6_i32 : i32 to vector<2x8xi32>
    %177 = arith.cmpi eq, %12, %176 : vector<2x8xi32>
    %178 = vector.shape_cast %170 : vector<2x1xf32> to vector<2x1xf32>
    %179 = vector.broadcast %178 : vector<2x1xf32> to vector<2x8xf32>
    %180 = arith.select %177, %179, %156 : vector<2x8xi1>, vector<2x8xf32>
    %181 = arith.truncf %175 : vector<2x32xf32> to vector<2x32xbf16>
    %cst_45 = arith.constant dense<0.000000e+00> : vector<2x128xf32>
    %182 = tpu.matmul %181, %0, %cst_45 {dimension_numbers = #tpu.dot_dimension_numbers<[1], [0], [0], [1], [0, 0, 1, 1], [], []>} : vector<2x32xbf16>, vector<32x128xbf16>, vector<2x128xf32> -> vector<2x128xf32>
    %183 = arith.addf %7, %182 : vector<2x128xf32>
    %184 = vector.extract_strided_slice %183 {offsets = [0, 32], sizes = [2, 8], strides = [1, 1]} : vector<2x128xf32> to vector<2x8xf32>
    %c7 = arith.constant 7 : index
    %c0_46 = arith.constant 0 : index
    %c0_47 = arith.constant 0 : index
    %185 = vector.load %arg5[%c7, %c0_46, %c0_47] : memref<8x2x8xf32, #tpu.memory_space<vmem>>, vector<1x2x8xf32>
    %186 = vector.shape_cast %185 : vector<1x2x8xf32> to vector<2x8xf32>
    %187 = vector.shape_cast %184 : vector<2x8xf32> to vector<1x2x8xf32>
    tpu.vector_store %arg5[%c7, %c0_46, %c0_47], %187 {strides = array<i32>} : memref<8x2x8xf32, #tpu.memory_space<vmem>>, vector<1x2x8xf32>,
    %c7_i32 = arith.constant 7 : i32
    %188 = vector.broadcast %c7_i32 : i32 to vector<2x8xi32>
    %189 = arith.cmpi eq, %12, %188 : vector<2x8xi32>
    %190 = vector.shape_cast %173 : vector<2x1xf32> to vector<2x1xf32>
    %191 = vector.broadcast %190 : vector<2x1xf32> to vector<2x8xf32>
    %192 = arith.select %189, %191, %180 : vector<2x8xi1>, vector<2x8xf32>
    %c0_48 = arith.constant 0 : index
    %c0_49 = arith.constant 0 : index
    %193 = vector.load %arg6[%c0_48, %c0_49] : memref<2x8xf32, #tpu.memory_space<vmem>>, vector<2x8xf32>
    tpu.vector_store %arg6[%c0_48, %c0_49], %192 {strides = array<i32>} : memref<2x8xf32, #tpu.memory_space<vmem>>, vector<2x8xf32>,
    return
  }
  func.func @transform_0(%arg0: i32) -> (i32, i32) {
    %c0_i32 = arith.constant 0 : i32
    %c0_i32_0 = arith.constant 0 : i32
    return %arg0, %c0_i32 : i32, i32
  }
  func.func @transform_1(%arg0: i32) -> (i32, i32) {
    %c0_i32 = arith.constant 0 : i32
    %c0_i32_0 = arith.constant 0 : i32
    %c0_i32_1 = arith.constant 0 : i32
    return %c0_i32, %c0_i32_0 : i32, i32
  }
  func.func @transform_2(%arg0: i32) -> (i32, i32) {
    %c0_i32 = arith.constant 0 : i32
    %c0_i32_0 = arith.constant 0 : i32
    %c0_i32_1 = arith.constant 0 : i32
    return %c0_i32, %c0_i32_0 : i32, i32
  }
  func.func @transform_3(%arg0: i32) -> (i32, i32) {
    %c0_i32 = arith.constant 0 : i32
    %c0_i32_0 = arith.constant 0 : i32
    %c0_i32_1 = arith.constant 0 : i32
    return %c0_i32, %c0_i32_0 : i32, i32
  }
  func.func @transform_4(%arg0: i32) -> (i32, i32, i32) {
    %c0_i32 = arith.constant 0 : i32
    %c0_i32_0 = arith.constant 0 : i32
    %c0_i32_1 = arith.constant 0 : i32
    return %c0_i32, %arg0, %c0_i32_0 : i32, i32, i32
  }
  func.func @transform_5(%arg0: i32) -> (i32, i32) {
    %c0_i32 = arith.constant 0 : i32
    %c0_i32_0 = arith.constant 0 : i32
    return %arg0, %c0_i32 : i32, i32
  }
}

</mosaic_0001>

<bundles_post_ra>
// kernel: tpu_custom_call.1
= control target key start
LH: loop header
LB: loop body
LE: loop exit
PB: predicated region body
PF: predicated region fallthrough
CT: control target
= control target key end

     0   :  { %11 = vsyncpa [#allocation3], 0  ;;  %s1215_s0 = inlined_call_operand.hbm [shape: f32[2,16], index: 0, kind: input, shape index: {}]   ;;  %s1216_s1 = inlined_call_operand.hbm [shape: bf16[16,128], index: 1, kind: input, shape index: {}]   ;;  %s1217_s2 = inlined_call_operand.hbm [shape: bf16[32,128], index: 2, kind: input, shape index: {}]   ;;  %s1218_s3 = inlined_call_operand.vmem [shape: f32[1,128], index: 3, kind: input, shape index: {}]   ;;  %s1219_s4 = inlined_call_operand.hbm [shape: f32[8,2,8], index: 4, kind: output, shape index: {0}]   ;;  %s1220_s5 = inlined_call_operand.hbm [shape: f32[2,8], index: 5, kind: output, shape index: {1}]  }
   0x1   :  { %12 = vsyncpa [#allocation6], 0 }
   0x2   :  { %13 = vsyncpa [#allocation4], 0 }
   0x3   :  { %14 = vsyncpa [#allocation10], 0  ;;  %s1003_s18 = smov [#allocation5]   ;;  %s885_s22 = scalar_lea.hbm %s1216_s1, 128 }
   0x4   :  { %s30_s19 = sshll.u32 %s1003_s18, 4  ;;  %p886_p0 = scmp.ne.s32.totalorder %s1216_s1, %s885_s22  ;;  %s31_s19 = int_to_ptr.vmem [resolvable:$true] %s30_s19 }
   0x5   :  { %p889_p1 = scmp.lt.u32.totalorder %s885_s22, %s1216_s1 }
   0x7   :  { %p891_p2 = pnand %p889_p1, %p886_p0 }
   0x9   :  { %894 = shalt.err (!%p891_p2)
}
   0xa   :  { %s895_s27 = scalar_lea.vmem %s31_s19, 128  ;;  %p900_p4 = scmp.lt.s32.totalorder %s31_s19, %s31_s19 }
   0xb   :  { %p896_p3 = scmp.ne.s32.totalorder %s31_s19, %s895_s27  ;;  %p901_p5 = scmp.lt.s32.totalorder %s895_s27, %s895_s27 }
   0xd   :  { %p902_p6 = por %p901_p5, %p900_p4 }
   0xf   :  { %p903_p7 = pnand %p902_p6, %p896_p3 }
  0x11   :  { %906 = shalt.err (!%p903_p7)
}
  0x12   :  { %s1004_s28 = smov 64   ;;  %s1005_s29 = smov 4  }
  0x13   :  { %36 = dma.hbm_to_vmem [thread:$0]  %s1216_s1, 128, %s31_s19, [#allocation6], %s1004_s28, %s1004_s28, %s1005_s29  }
  0x14   :  { %s1006_s7 = smov [#allocation2]   ;;  %s1007_s9 = smov [#allocation7]  }
  0x15   :  { %s21_s8 = sshll.u32 %s1006_s7, 4  ;;  %s42_s10 = sshll.u32 %s1007_s9, 4  ;;  %s22_s8 = int_to_ptr.vmem [resolvable:$true] %s21_s8  ;;  %s43_s10 = int_to_ptr.vmem [resolvable:$true] %s42_s10 }
  0x16   :  { %s907_s13 = scalar_lea.hbm %s1215_s0, 32 }
  0x17   :  { %p908_p8 = scmp.ne.s32.totalorder %s1215_s0, %s907_s13  ;;  %p911_p9 = scmp.lt.u32.totalorder %s907_s13, %s1215_s0 }
  0x19   :  { %p913_p10 = pnand %p911_p9, %p908_p8 }
  0x1b   :  { %916 = shalt.err (!%p913_p10)
}
  0x1c   :  { %s917_s1 = scalar_lea.vmem %s22_s8, 32  ;;  %p922_p12 = scmp.lt.s32.totalorder %s22_s8, %s22_s8 }
  0x1d   :  { %p918_p11 = scmp.ne.s32.totalorder %s22_s8, %s917_s1  ;;  %p923_p13 = scmp.lt.s32.totalorder %s917_s1, %s917_s1 }
  0x1f   :  { %p924_p0 = por %p923_p13, %p922_p12 }
  0x21   :  { %p925_p1 = pnand %p924_p0, %p918_p11 }
  0x23   :  { %928 = shalt.err (!%p925_p1)
}
  0x24   :  { %24 = dma.hbm_to_vmem [thread:$0]  %s1215_s0, 32, %s22_s8, [#allocation3]  }
  0x25   :  { %s929_s22 = scalar_lea.hbm %s1217_s2, 256 }
  0x26   :  { %p930_p2 = scmp.ne.s32.totalorder %s1217_s2, %s929_s22  ;;  %p933_p3 = scmp.lt.u32.totalorder %s929_s22, %s1217_s2 }
  0x28   :  { %p935_p4 = pnand %p933_p3, %p930_p2 }
  0x2a   :  { %938 = shalt.err (!%p935_p4)
}
  0x2b   :  { %s939_s27 = scalar_lea.vmem %s43_s10, 256  ;;  %p944_p6 = scmp.lt.s32.totalorder %s43_s10, %s43_s10 }
  0x2c   :  { %p940_p5 = scmp.ne.s32.totalorder %s43_s10, %s939_s27  ;;  %p945_p7 = scmp.lt.s32.totalorder %s939_s27, %s939_s27 }
  0x2e   :  { %p946_p8 = por %p945_p7, %p944_p6 }
  0x30   :  { %p947_p9 = pnand %p946_p8, %p940_p5 }
  0x32   :  { %950 = shalt.err (!%p947_p9)
}
  0x33   :  { %48 = dma.hbm_to_vmem [thread:$0]  %s1217_s2, 256, %s43_s10, [#allocation6], %s1004_s28, %s1004_s28, %s1005_s29  }
  0x34   :  { %995 = dma.done.wait [#allocation3], 32  }
  0x35   :  { %996 = vsyncadd [#allocation3], 4294967264 }
  0x36   :  { %997 = dma.done.wait [#allocation6], 384  }
  0x37   :  { %998 = vsyncadd [#allocation6], 4294966912  ;;  %v1008_v0 = vmov 0.0   ;;  %vm1009_vm0 = vmmov 0   ;;  %v838_v1 = vld [vmem:[#allocation5] sm:$0xff]   ;;  %vm82_vm1 = vcmask 130048  }
  0x38   :  { %753 = vmatprep.subr.bf16.mxu0 %v1008_v0  ;;  %755 = vmatprep.mubr.msk.bf16.mxu0 %vm1009_vm0, %v1008_v0  ;;  %v66_v2 = vld [vmem:[#allocation2] sm:$0x3]  ;;  %v1097_v4 = vld [vmem:[#allocation7] sm:$0xff]   ;;  %v1100_v5 = vld [vmem:[#allocation7 + $0x8] sm:$0xff]   ;;  %vm142_vm2 = vcmask 261120   ;;  %v1010_v14 = vmov 40  }
  0x39   :  { %759 = vmatprep.subr.bf16.mxu1 %v1008_v0  ;;  %763 = vmatprep.mubr.msk.bf16.mxu1 %vm1009_vm0, %v1008_v0  ;;  %v67_v3 = vpack.c.bf16 %v66_v2, %v66_v2  ;;  %v707_v6 = vld [vmem:[%s1218_s3] ss:$0 sm:$0xff]  ;;  %s1011_s3 = smov 96   ;;  %vm191_vm3 = vcmask 58368   ;;  %s1012_s29 = smov [#allocation9]  }
  0x3a   :  { %754 = vmatpush3.bf16.msra.mxu0 %v838_v1  ;;  %760 = vmatpush3.bf16.msra.mxu1 %v1097_v4  ;;  %s693_s6 = sshll.u32 %s1012_s29, 4  ;;  %s694_s6 = int_to_ptr.vmem [resolvable:$true] %s693_s6 }
  0x3b   :  { %767 = vmatprep.subr.bf16.mxu0 %v1008_v0  ;;  %761 = vmatprep.subr.bf16.mxu1 %v1008_v0  ;;  %s951_s7 = scalar_lea.vmem %s694_s6, 32  ;;  %p956_p11 = scmp.lt.s32.totalorder %s694_s6, %s694_s6 }
  0x3c   :  { %836 = vset.pattern.permute.xlu0 %v1010_v14  ;;  %837 = vset.pattern.permute.xlu1 %v1010_v14  ;;  %p952_p10 = scmp.ne.s32.totalorder %s694_s6, %s951_s7  ;;  %p957_p12 = scmp.lt.s32.totalorder %s951_s7, %s951_s7 }
  0x3d   :  { %756 = vmatmul.mubr.msk.bf16.vlgmr.msra.gmra.mrb[0].mxu0 %vm82_vm1, %v67_v3 }
  0x3e   :  { %771 = vmatprep.mubr.msk.bf16.mxu0 %vm1009_vm0, %v1008_v0  ;;  %768 = vmatpush3.bf16.msra.mxu0 %v1097_v4  ;;  %p958_p13 = por %p957_p12, %p956_p11 }
  0x3f   :  { %769 = vmatprep.subr.bf16.mxu0 %v1008_v0  ;;  %762 = vmatpush3.bf16.msra.mxu1 %v1100_v5 }
  0x40   :  { %775 = vmatprep.subr.bf16.mxu1 %v1008_v0  ;;  %p959_p0 = pnand %p958_p13, %p952_p10 }
  0x42   :  { %770 = vmatpush3.bf16.msra.mxu0 %v1100_v5 }
  0x43   :  { %783 = vmatprep.subr.bf16.mxu0 %v1008_v0 }
 0x110   :  { %v120_v7 = vpop.f32.mrb[0].mxu0 }
 0x111   :  { %v1112_v8 = vadd.f32 %v707_v6, %v120_v7  ;;  %v757_v9 = vpop.f32.mrb[1].mxu0 }
 0x112   :  { %v123_v10 = vpop.f32.mrb[2].mxu0 }
 0x113   :  { %v758_v11 = vpop.f32.mrb[3].mxu0  ;;  %841 = vtanh.f32 %v1112_v8 }
 0x11d   :  { %v842_v12 = vpop.eup %841 }
 0x11e   :  { %v129_v13 = vpack.c.bf16 %v842_v12, %v842_v12 }
 0x120   :  { %764 = vmatmul.mubr.msk.bf16.vlgmr.msra.gmra.mrb[0].mxu1 %vm142_vm2, %v129_v13 }
 0x121   :  { %776 = vmatpush3.bf16.msra.mxu1 %v1097_v4  ;;  %779 = vmatprep.mubr.msk.bf16.mxu1 %vm1009_vm0, %v1008_v0 }
 0x122   :  { %777 = vmatprep.subr.bf16.mxu1 %v1008_v0 }
 0x125   :  { %778 = vmatpush3.bf16.msra.mxu1 %v1100_v5 }
 0x126   :  { %791 = vmatprep.subr.bf16.mxu1 %v1008_v0 }
 0x1f3   :  { %v180_v15 = vpop.f32.mrb[0].mxu1 }
 0x1f4   :  { %v186_v16 = vadd.f32 %v180_v15, %v1112_v8  ;;  %v765_v17 = vpop.f32.mrb[1].mxu1 }
 0x1f5   :  { %v183_v18 = vpop.f32.mrb[2].mxu1 }
 0x1f6   :  { %v713_v19 = vmul.f32 -1.442695, %v186_v16  ;;  %843 = vtanh.f32 %v186_v16  ;;  %188 = vrot.lane.b32.xlu0 %v186_v16, %s1011_s3  ;;  %v766_v20 = vpop.f32.mrb[3].mxu1 }
 0x1f8   :  { %845 = vpow2.f32 %v713_v19 }
 0x200   :  { %v844_v21 = vpop.eup %843 }
 0x201   :  { %v208_v22 = vpack.c.bf16 %v844_v21, %v844_v21 }
 0x202   :  { %v846_v23 = vpop.eup %845 }
 0x203   :  { %v196_v24 = vadd.f32 1.0, %v846_v23  ;;  %772 = vmatmul.mubr.msk.bf16.vlgmr.msra.gmra.mrb[4].mxu0 %vm142_vm2, %v208_v22 }
 0x204   :  { %784 = vmatpush3.bf16.msra.mxu0 %v1097_v4  ;;  %787 = vmatprep.mubr.msk.bf16.mxu0 %vm1009_vm0, %v1008_v0 }
 0x205   :  { %847 = vrcp.f32 %v196_v24  ;;  %785 = vmatprep.subr.bf16.mxu0 %v1008_v0 }
 0x208   :  { %786 = vmatpush3.bf16.msra.mxu0 %v1100_v5 }
 0x209   :  { %799 = vmatprep.subr.bf16.mxu0 %v1008_v0 }
 0x20f   :  { %v848_v25 = vpop.eup %847 }
 0x210   :  { %204 = vperm.xlu0 %836, %v848_v25   ;;  %v199_v37 = vsub.f32 1.0, %v848_v25 }
 0x268   :  { %v189_v26 = vpop.permute.xlu0 %188 }
 0x269   :  { %192 = vst.msk [vmem:[#allocation8] sm:$0x3] %vm191_vm3, %v189_v26 }
 0x28f   :  { %v1151_v57 = vpop.permute.xlu0 %204 }
 0x2d6   :  { %v246_v27 = vpop.f32.mrb[4].mxu0 }
 0x2d7   :  { %v252_v28 = vadd.f32 %v246_v27, %v1112_v8  ;;  %v773_v29 = vpop.f32.mrb[5].mxu0 }
 0x2d8   :  { %v249_v30 = vpop.f32.mrb[6].mxu0 }
 0x2d9   :  { %v715_v31 = vmul.f32 -1.442695, %v252_v28  ;;  %849 = vtanh.f32 %v252_v28  ;;  %254 = vrot.lane.b32.xlu1 %v252_v28, %s1011_s3  ;;  %v774_v32 = vpop.f32.mrb[7].mxu0 }
 0x2db   :  { %851 = vpow2.f32 %v715_v31 }
 0x2e3   :  { %v850_v33 = vpop.eup %849 }
 0x2e4   :  { %v276_v34 = vpack.c.bf16 %v850_v33, %v850_v33 }
 0x2e5   :  { %v852_v35 = vpop.eup %851 }
 0x2e6   :  { %v262_v36 = vadd.f32 1.0, %v852_v35  ;;  %780 = vmatmul.mubr.msk.bf16.vlgmr.msra.gmra.mrb[4].mxu1 %vm142_vm2, %v276_v34 }
 0x2e7   :  { %792 = vmatpush3.bf16.msra.mxu1 %v1097_v4  ;;  %795 = vmatprep.mubr.msk.bf16.mxu1 %vm1009_vm0, %v1008_v0 }
 0x2e8   :  { %853 = vrcp.f32 %v262_v36  ;;  %793 = vmatprep.subr.bf16.mxu1 %v1008_v0 }
 0x2eb   :  { %794 = vmatpush3.bf16.msra.mxu1 %v1100_v5 }
 0x2ec   :  { %807 = vmatprep.subr.bf16.mxu1 %v1008_v0 }
 0x2f2   :  { %v854_v38 = vpop.eup %853 }
 0x2f3   :  { %v265_v39 = vmul.f32 %v854_v38, %v199_v37  ;;  %v266_v40 = vsub.f32 1.0, %v854_v38 }
 0x2f5   :  { %272 = vperm.xlu0 %836, %v265_v39   ;;  %v267_v41 = vmul.f32 %v266_v40, %v199_v37 }
 0x34b   :  { %v255_v42 = vpop.permute.xlu1 %254 }
 0x34c   :  { %258 = vst.msk [vmem:[#allocation8 + $0x2] sm:$0x3] %vm191_vm3, %v255_v42 }
 0x374   :  { %v1153_v58 = vpop.permute.xlu0 %272 }
 0x3b9   :  { %v314_v43 = vpop.f32.mrb[4].mxu1 }
 0x3ba   :  { %v320_v44 = vadd.f32 %v314_v43, %v1112_v8  ;;  %v781_v45 = vpop.f32.mrb[5].mxu1 }
 0x3bb   :  { %v317_v46 = vpop.f32.mrb[6].mxu1 }
 0x3bc   :  { %v717_v47 = vmul.f32 -1.442695, %v320_v44  ;;  %855 = vtanh.f32 %v320_v44  ;;  %322 = vrot.lane.b32.xlu0 %v320_v44, %s1011_s3  ;;  %v782_v48 = vpop.f32.mrb[7].mxu1 }
 0x3be   :  { %857 = vpow2.f32 %v717_v47 }
 0x3c6   :  { %v856_v49 = vpop.eup %855 }
 0x3c7   :  { %v344_v50 = vpack.c.bf16 %v856_v49, %v856_v49 }
 0x3c8   :  { %v858_v51 = vpop.eup %857 }
 0x3c9   :  { %v330_v52 = vadd.f32 1.0, %v858_v51  ;;  %788 = vmatmul.mubr.msk.bf16.vlgmr.msra.gmra.mrb[8].mxu0 %vm142_vm2, %v344_v50 }
 0x3ca   :  { %800 = vmatpush3.bf16.msra.mxu0 %v1097_v4  ;;  %803 = vmatprep.mubr.msk.bf16.mxu0 %vm1009_vm0, %v1008_v0 }
 0x3cb   :  { %859 = vrcp.f32 %v330_v52  ;;  %801 = vmatprep.subr.bf16.mxu0 %v1008_v0 }
 0x3ce   :  { %802 = vmatpush3.bf16.msra.mxu0 %v1100_v5 }
 0x3cf   :  { %815 = vmatprep.subr.bf16.mxu0 %v1008_v0 }
 0x3d5   :  { %v860_v53 = vpop.eup %859 }
 0x3d6   :  { %v333_v54 = vmul.f32 %v860_v53, %v267_v41  ;;  %v334_v55 = vsub.f32 1.0, %v860_v53 }
 0x3d8   :  { %340 = vperm.xlu1 %837, %v333_v54   ;;  %v335_v56 = vmul.f32 %v334_v55, %v267_v41  ;;  %v127_v55 = vlaneseq }
 0x42e   :  { %v323_v59 = vpop.permute.xlu0 %322 }
 0x42f   :  { %326 = vst.msk [vmem:[#allocation8 + $0x4] sm:$0x3] %vm191_vm3, %v323_v59 }
 0x457   :  { %v1164_v14 = vpop.permute.xlu1 %340 }
 0x49c   :  { %v382_v60 = vpop.f32.mrb[8].mxu0 }
 0x49d   :  { %v388_v61 = vadd.f32 %v382_v60, %v1112_v8  ;;  %v789_v62 = vpop.f32.mrb[9].mxu0 }
 0x49e   :  { %v385_v63 = vpop.f32.mrb[10].mxu0 }
 0x49f   :  { %v719_v1 = vmul.f32 -1.442695, %v388_v61  ;;  %861 = vtanh.f32 %v388_v61  ;;  %v790_v2 = vpop.f32.mrb[11].mxu0  ;;  %390 = vrot.lane.b32.xlu1 %v388_v61, %s1011_s3 }
 0x4a1   :  { %863 = vpow2.f32 %v719_v1 }
 0x4a9   :  { %v862_v3 = vpop.eup %861 }
 0x4aa   :  { %v412_v6 = vpack.c.bf16 %v862_v3, %v862_v3 }
 0x4ab   :  { %v864_v7 = vpop.eup %863 }
 0x4ac   :  { %v398_v9 = vadd.f32 1.0, %v864_v7  ;;  %796 = vmatmul.mubr.msk.bf16.vlgmr.msra.gmra.mrb[8].mxu1 %vm142_vm2, %v412_v6 }
 0x4ad   :  { %808 = vmatpush3.bf16.msra.mxu1 %v1097_v4  ;;  %811 = vmatprep.mubr.msk.bf16.mxu1 %vm1009_vm0, %v1008_v0 }
 0x4ae   :  { %865 = vrcp.f32 %v398_v9  ;;  %809 = vmatprep.subr.bf16.mxu1 %v1008_v0 }
 0x4b1   :  { %810 = vmatpush3.bf16.msra.mxu1 %v1100_v5 }
 0x4b8   :  { %v866_v10 = vpop.eup %865 }
 0x4b9   :  { %v401_v11 = vmul.f32 %v866_v10, %v335_v56  ;;  %v402_v12 = vsub.f32 1.0, %v866_v10 }
 0x4bb   :  { %408 = vperm.xlu1 %837, %v401_v11   ;;  %v403_v13 = vmul.f32 %v402_v12, %v335_v56  ;;  %v128_v56 = vand.u32 127, %v127_v55 }
 0x4bd   :  { %vm201_vm4 = vcmp.eq.s32.totalorder %v128_v56, 0  ;;  %vm269_vm5 = vcmp.eq.s32.totalorder %v128_v56, 1  ;;  %vm337_vm6 = vcmp.eq.s32.totalorder %v128_v56, 2  ;;  %vm405_vm7 = vcmp.eq.s32.totalorder %v128_v56, 3 }
 0x4be   :  { %v207_v60 = vsel %vm201_vm4, %v1151_v57, 0.0  ;;  %vm473_vm8 = vcmp.eq.s32.totalorder %v128_v56, 4  ;;  %vm541_vm9 = vcmp.eq.s32.totalorder %v128_v56, 5  ;;  %vm609_vm10 = vcmp.eq.s32.totalorder %v128_v56, 6 }
 0x4bf   :  { %v275_v61 = vsel %vm269_vm5, %v1153_v58, %v207_v60  ;;  %vm667_vm11 = vcmp.eq.s32.totalorder %v128_v56, 7 }
 0x4c0   :  { %v343_v63 = vsel %vm337_vm6, %v1164_v14, %v275_v61 }
 0x511   :  { %v391_v15 = vpop.permute.xlu1 %390 }
 0x512   :  { %394 = vst.msk [vmem:[#allocation8 + $0x6] sm:$0x3] %vm191_vm3, %v391_v15 }
 0x53a   :  { %v409_v59 = vpop.permute.xlu1 %408 }
 0x53b   :  { %v411_v2 = vsel %vm405_vm7, %v409_v59, %v343_v63 }
 0x57f   :  { %v450_v16 = vpop.f32.mrb[8].mxu1 }
 0x580   :  { %v456_v17 = vadd.f32 %v450_v16, %v1112_v8  ;;  %v797_v18 = vpop.f32.mrb[9].mxu1 }
 0x581   :  { %v453_v19 = vpop.f32.mrb[10].mxu1 }
 0x582   :  { %v721_v20 = vmul.f32 -1.442695, %v456_v17  ;;  %867 = vtanh.f32 %v456_v17  ;;  %v798_v21 = vpop.f32.mrb[11].mxu1 }
 0x584   :  { %869 = vpow2.f32 %v721_v20 }
 0x58c   :  { %v868_v22 = vpop.eup %867 }
 0x58d   :  { %v480_v23 = vpack.c.bf16 %v868_v22, %v868_v22 }
 0x58e   :  { %v870_v24 = vpop.eup %869 }
 0x58f   :  { %v466_v25 = vadd.f32 1.0, %v870_v24  ;;  %804 = vmatmul.mubr.msk.bf16.vlgmr.msra.gmra.mrb[12].mxu0 %vm142_vm2, %v480_v23 }
 0x590   :  { %816 = vmatpush3.bf16.msra.mxu0 %v1097_v4  ;;  %819 = vmatprep.mubr.msk.bf16.mxu0 %vm1009_vm0, %v1008_v0 }
 0x591   :  { %871 = vrcp.f32 %v466_v25  ;;  %817 = vmatprep.subr.bf16.mxu0 %v1008_v0 }
 0x594   :  { %818 = vmatpush3.bf16.msra.mxu0 %v1100_v5 }
 0x59b   :  { %v872_v26 = vpop.eup %871 }
 0x59c   :  { %v469_v27 = vmul.f32 %v872_v26, %v403_v13  ;;  %v470_v28 = vsub.f32 1.0, %v872_v26 }
 0x59e   :  { %476 = vperm.xlu0 %836, %v469_v27   ;;  %v471_v29 = vmul.f32 %v470_v28, %v403_v13 }
 0x61d   :  { %v477_v62 = vpop.permute.xlu0 %476 }
 0x61e   :  { %v479_v3 = vsel %vm473_vm8, %v477_v62, %v411_v2 }
 0x662   :  { %v518_v30 = vpop.f32.mrb[12].mxu0 }
 0x663   :  { %v524_v31 = vadd.f32 %v518_v30, %v1112_v8  ;;  %v805_v32 = vpop.f32.mrb[13].mxu0 }
 0x664   :  { %v521_v33 = vpop.f32.mrb[14].mxu0 }
 0x665   :  { %v723_v34 = vmul.f32 -1.442695, %v524_v31  ;;  %873 = vtanh.f32 %v524_v31  ;;  %v806_v4 = vpop.f32.mrb[15].mxu0 }
 0x667   :  { %875 = vpow2.f32 %v723_v34 }
 0x66f   :  { %v874_v35 = vpop.eup %873 }
 0x670   :  { %v548_v36 = vpack.c.bf16 %v874_v35, %v874_v35 }
 0x671   :  { %v876_v37 = vpop.eup %875 }
 0x672   :  { %v534_v0 = vadd.f32 1.0, %v876_v37  ;;  %812 = vmatmul.mubr.msk.bf16.vlgmr.msra.gmra.mrb[12].mxu1 %vm142_vm2, %v548_v36 }
 0x674   :  { %877 = vrcp.f32 %v534_v0 }
 0x67e   :  { %v878_v5 = vpop.eup %877 }
 0x67f   :  { %v537_v38 = vmul.f32 %v878_v5, %v471_v29  ;;  %v538_v39 = vsub.f32 1.0, %v878_v5 }
 0x681   :  { %544 = vperm.xlu1 %837, %v537_v38   ;;  %v539_v40 = vmul.f32 %v538_v39, %v471_v29 }
 0x700   :  { %v545_v1 = vpop.permute.xlu1 %544 }
 0x701   :  { %v547_v6 = vsel %vm541_vm9, %v545_v1, %v479_v3 }
 0x745   :  { %v586_v41 = vpop.f32.mrb[12].mxu1 }
 0x746   :  { %v592_v42 = vadd.f32 %v586_v41, %v1112_v8  ;;  %v813_v43 = vpop.f32.mrb[13].mxu1 }
 0x747   :  { %v589_v44 = vpop.f32.mrb[14].mxu1 }
 0x748   :  { %v725_v45 = vmul.f32 -1.442695, %v592_v42  ;;  %879 = vtanh.f32 %v592_v42  ;;  %v814_v46 = vpop.f32.mrb[15].mxu1 }
 0x74a   :  { %881 = vpow2.f32 %v725_v45 }
 0x752   :  { %v880_v47 = vpop.eup %879 }
 0x753   :  { %v616_v48 = vpack.c.bf16 %v880_v47, %v880_v47 }
 0x754   :  { %v882_v49 = vpop.eup %881 }
 0x755   :  { %v602_v50 = vadd.f32 1.0, %v882_v49  ;;  %820 = vmatmul.mubr.msk.bf16.vlgmr.msra.gmra.mrb[16].mxu0 %vm142_vm2, %v616_v48 }
 0x757   :  { %883 = vrcp.f32 %v602_v50 }
 0x761   :  { %v884_v51 = vpop.eup %883 }
 0x762   :  { %v605_v52 = vmul.f32 %v884_v51, %v539_v40  ;;  %v606_v53 = vsub.f32 1.0, %v884_v51 }
 0x764   :  { %612 = vperm.xlu0 %836, %v605_v52   ;;  %v607_v54 = vmul.f32 %v606_v53, %v539_v40 }
 0x766   :  { %670 = vperm.xlu1 %837, %v607_v54  }
 0x768   :  { %458 = vrot.lane.b32.xlu0 %v456_v17, %s1011_s3 }
 0x76a   :  { %526 = vrot.lane.b32.xlu1 %v524_v31, %s1011_s3 }
 0x76c   :  { %594 = vrot.lane.b32.xlu0 %v592_v42, %s1011_s3 }
 0x7e3   :  { %v613_v7 = vpop.permute.xlu0 %612 }
 0x7e4   :  { %v615_v9 = vsel %vm609_vm10, %v613_v7, %v547_v6 }
 0x7e5   :  { %v671_v10 = vpop.permute.xlu1 %670 }
 0x7e6   :  { %v673_v11 = vsel %vm667_vm11, %v671_v10, %v615_v9 }
 0x7e7   :  { %674 = vst.msk [vmem:[#allocation9] sm:$0x3] %vm191_vm3, %v673_v11  ;;  %v459_v57 = vpop.permute.xlu0 %458 }
 0x7e8   :  { %462 = vst.msk [vmem:[#allocation8 + $0x8] sm:$0x3] %vm191_vm3, %v459_v57 }
 0x7e9   :  { %v527_v58 = vpop.permute.xlu1 %526 }
 0x7ea   :  { %530 = vst.msk [vmem:[#allocation8 + $0xa] sm:$0x3] %vm191_vm3, %v527_v58 }
 0x7eb   :  { %v595_v12 = vpop.permute.xlu0 %594 }
 0x7ec   :  { %598 = vst.msk [vmem:[#allocation8 + $0xc] sm:$0x3] %vm191_vm3, %v595_v12 }
 0x7ed   :  { %962 = shalt.err (!%p959_p0)
}
 0x7ee   :  { %s963_s10 = scalar_lea.hbm %s1220_s5, 32 }
 0x7ef   :  { %p964_p1 = scmp.ne.s32.totalorder %s1220_s5, %s963_s10  ;;  %p967_p2 = scmp.lt.u32.totalorder %s963_s10, %s1220_s5 }
 0x7f1   :  { %p969_p3 = pnand %p967_p2, %p964_p1 }
 0x7f3   :  { %972 = shalt.err (!%p969_p3)
}
 0x7f4   :  { %696 = dma.vmem_to_hbm [thread:$0]  %s694_s6, 32, %s1220_s5, [#allocation10]  }
 0x7f5   :  { %s1013_s17 = smov [#allocation8]  }
 0x7f6   :  { %s680_s1 = sshll.u32 %s1013_s17, 4  ;;  %s681_s1 = int_to_ptr.vmem [resolvable:$true] %s680_s1 }
 0x7f7   :  { %s973_s18 = scalar_lea.vmem %s681_s1, 256  ;;  %p978_p5 = scmp.lt.s32.totalorder %s681_s1, %s681_s1 }
 0x7f8   :  { %p974_p4 = scmp.ne.s32.totalorder %s681_s1, %s973_s18  ;;  %p979_p6 = scmp.lt.s32.totalorder %s973_s18, %s973_s18 }
 0x7fa   :  { %p980_p7 = por %p979_p6, %p978_p5 }
 0x7fc   :  { %p981_p8 = pnand %p980_p7, %p974_p4 }
 0x828   :  { %v654_v13 = vpop.f32.mrb[16].mxu0 }
 0x829   :  { %v660_v14 = vadd.f32 %v654_v13, %v1112_v8  ;;  %v821_v15 = vpop.f32.mrb[17].mxu0 }
 0x82a   :  { %v657_v16 = vpop.f32.mrb[18].mxu0 }
 0x82b   :  { %v822_v17 = vpop.f32.mrb[19].mxu0  ;;  %662 = vrot.lane.b32.xlu1 %v660_v14, %s1011_s3 }
 0x89d   :  { %v663_v18 = vpop.permute.xlu1 %662 }
 0x89e   :  { %666 = vst.msk [vmem:[#allocation8 + $0xe] sm:$0x3] %vm191_vm3, %v663_v18 }
 0x89f   :  { %984 = shalt.err (!%p981_p8)
}
 0x8a0   :  { %s985_s20 = scalar_lea.hbm %s1219_s4, 256 }
 0x8a1   :  { %p986_p9 = scmp.ne.s32.totalorder %s1219_s4, %s985_s20  ;;  %p989_p10 = scmp.lt.u32.totalorder %s985_s20, %s1219_s4 }
 0x8a3   :  { %p991_p11 = pnand %p989_p10, %p986_p9 }
 0x8a5   :  { %994 = shalt.err (!%p991_p11)
}
 0x8a6   :  { %s1014_s25 = smov 32   ;;  %s1015_s26 = smov 2  }
 0x8a7   :  { %686 = dma.vmem_to_hbm [thread:$0]  %s681_s1, 256, %s1219_s4, [#allocation4], %s1014_s25, %s1014_s25, %s1015_s26  }
 0x8a8   :  { %999 = dma.done.wait [#allocation4], 256  }
 0x8a9   :  { %1000 = vsyncadd [#allocation4], 4294967040 }
 0x8aa   :  { %1001 = dma.done.wait [#allocation10], 32  }
 0x8ab   :  { %1002 = vsyncadd [#allocation10], 4294967264 }
 0x8ac   :  { %703 = vsyncpa [#allocation3], 1 }
 0x8ad   :  { %704 = vsyncpa [#allocation6], 1 }
 0x8ae   :  { %705 = vsyncpa [#allocation4], 1 }
 0x8af   :  { %706 = vsyncpa [#allocation10], 1 }

</bundles_post_ra>
